<compile_context>
chip_gen: v6e
topology: v6e:2x2x1
jax: 0.10.0
libtpu: 0.0.40
codegen_flags: <defaults>
</compile_context>

<pallas_src>
import functools
import math

import jax
import jax.numpy as jnp
from jax.experimental import pallas as pl
from jax.experimental.pallas import tpu as pltpu


# ----------------------------- Pallas kernel -------------------------------

def patch_embed_kernel(x_ref, wt_ref, pe_ref, out_ref):
    """One MXU matmul per grid step + broadcast positional-embedding add.

    x_ref  : (block_rows, patch_len)  flattened patches (compute dtype, e.g. bf16)
    wt_ref : (patch_len, d_model)     value_embedding weight, pre-transposed (resident)
    pe_ref : (P, d_model) f32         positional embedding (resident, NOT tiled)
    out_ref: (block_n, P, d_model)    block_rows == block_n * P
    """
    block_n, num_patches, d_model = out_ref.shape
    y = jnp.dot(x_ref[...], wt_ref[...], preferred_element_type=jnp.float32)
    y = y.reshape(block_n, num_patches, d_model) + pe_ref[...][None, :, :]
    out_ref[...] = y.astype(out_ref.dtype)


# ------------------------------- Helpers ------------------------------------

def _positional_embedding(num_patches, d_model):
    """Matches the PyTorch PositionalEmbedding buffer pe[:, :num_patches]."""
    position = jnp.arange(num_patches, dtype=jnp.float32)[:, None]           # (P, 1)
    div_term = jnp.exp(
        jnp.arange(0, d_model, 2, dtype=jnp.float32) * (-math.log(10000.0) / d_model))
    pe = jnp.zeros((num_patches, d_model), jnp.float32)
    pe = pe.at[:, 0::2].set(jnp.sin(position * div_term))
    pe = pe.at[:, 1::2].set(jnp.cos(position * div_term))
    return pe


def _choose_block_n(N, P, *, target_rows, rows_multiple, min_steps=2):
    """Largest divisor of N giving block_rows <= target_rows, a multiple of the
    sublane packing, and (when possible) >= min_steps grid steps so pipelining
    works and v7x's two TensorCores both get a 'parallel' step."""
    divisors = [d for d in range(1, N + 1) if N % d == 0]

    def legal(d):
        rows = d * P
        return rows % rows_multiple == 0 or d == N     # full-extent block is exempt

    cands = [d for d in divisors
             if d * P <= target_rows and legal(d) and N // d >= min_steps]
    if not cands:
        cands = [d for d in divisors if d * P <= target_rows and legal(d)]
    if not cands:
        cands = [N]
    return max(cands)


# ------------------------------- Wrapper ------------------------------------

@functools.partial(
    jax.jit,
    static_argnames=("d_model", "patch_len", "stride", "padding",
                     "target_rows", "compute_dtype", "out_dtype"))
def _patch_embedding_impl(x, weight, *, d_model, patch_len, stride, padding,
                          target_rows, compute_dtype, out_dtype):
    B, n_vars, L = x.shape

    # ReplicationPad1d((0, padding)): repeat the last time-step `padding` times.
    if padding > 0:
        pad = jnp.broadcast_to(x[..., -1:], (B, n_vars, padding))
        x = jnp.concatenate([x, pad], axis=-1)
    Lp = L + padding

    # unfold(dimension=-1, size=patch_len, step=stride)
    # TODO(synk): fold the pad+unfold into the kernel (two shifted matmuls when
    # stride | patch_len) to avoid materializing duplicated patches in HBM.
    P = (Lp - patch_len) // stride + 1
    idx = jnp.arange(P)[:, None] * stride + jnp.arange(patch_len)[None, :]
    patches = x[..., idx]                                 # (B, n_vars, P, patch_len)

    N = B * n_vars
    x2d = patches.reshape(N * P, patch_len).astype(compute_dtype)
    wt = weight.T.astype(compute_dtype)                   # (patch_len, d_model): MXU RHS
    pe = _positional_embedding(P, d_model)                # (P, d_model) f32, resident

    rows_multiple = 8 * (4 // jnp.dtype(compute_dtype).itemsize)   # 8 f32 / 16 bf16
    block_n = _choose_block_n(N, P, target_rows=target_rows,
                              rows_multiple=rows_multiple)
    block_rows = block_n * P
    grid = (N // block_n,)

    out = pl.pallas_call(
        patch_embed_kernel,
        out_shape=jax.ShapeDtypeStruct((N, P, d_model), out_dtype),
        grid_spec=pltpu.PrefetchScalarGridSpec(
            num_scalar_prefetch=0,
            grid=grid,
            in_specs=[
                pl.BlockSpec((block_rows, patch_len), lambda i: (i, 0)),  # patches
                pl.BlockSpec((patch_len, d_model), lambda i: (0, 0)),     # W^T (resident)
                pl.BlockSpec((P, d_model), lambda i: (0, 0)),             # pe  (resident)
            ],
            out_specs=pl.BlockSpec((block_n, P, d_model), lambda i: (i, 0, 0)),
        ),
        compiler_params=pltpu.CompilerParams(
            dimension_semantics=("parallel",),
            vmem_limit_bytes=32 * 1024 * 1024,
        ),
    )(x2d, wt, pe)

    # TODO(synk): if patch_len/P grow, pack 8 patches per row (K=128) against a
    # block-diagonal weight to make the LHS lane-dense and fill the MXU depth.
    return out


def patch_embedding_forward(x, weight, *, d_model, patch_len, stride, padding,
                            target_rows=1024, compute_dtype=jnp.bfloat16,
                            out_dtype=jnp.float32):
    """x: [B, n_vars, L] f32, weight: [d_model, patch_len] (PyTorch Linear layout).

    Returns (out, n_vars) with out: [B * n_vars, num_patches, d_model].
    Dropout is an inference identity and is therefore not emitted.
    """
    n_vars = x.shape[1]
    out = _patch_embedding_impl(
        x, weight, d_model=d_model, patch_len=patch_len, stride=stride,
        padding=padding, target_rows=target_rows,
        compute_dtype=compute_dtype, out_dtype=out_dtype)
    return out, n_vars


# ------------------------- Pure-JAX reference -------------------------------

def reference_forward(x, weight, *, d_model, patch_len, stride, padding,
                      compute_dtype=jnp.float32):
    B, n_vars, L = x.shape
    if padding > 0:
        pad = jnp.broadcast_to(x[..., -1:], (B, n_vars, padding))
        x = jnp.concatenate([x, pad], axis=-1)
    Lp = L + padding
    P = (Lp - patch_len) // stride + 1
    idx = jnp.arange(P)[:, None] * stride + jnp.arange(patch_len)[None, :]
    patches = x[..., idx].reshape(B * n_vars, P, patch_len)
    val = jnp.dot(patches.astype(compute_dtype), weight.T.astype(compute_dtype),
                  preferred_element_type=jnp.float32)     # Linear, bias=False
    pe = _positional_embedding(P, d_model)
    return val + pe[None], n_vars


# --------------------------------- Main --------------------------------------

if __name__ == "__main__":
    # Small shapes consistent with the module: batch=2, n_vars=4, seq_len=64,
    # patch_len=16, stride=8, padding=stride, d_model=128.
    B, n_vars, L = 2, 4, 64
    d_model, patch_len, stride, padding = 128, 16, 8, 8

    key = jax.random.PRNGKey(0)
    kx, kw = jax.random.split(key)
    x = jax.random.normal(kx, (B, n_vars, L), dtype=jnp.float32)
    # PyTorch nn.Linear default init: U(-1/sqrt(fan_in), 1/sqrt(fan_in)).
    bound = 1.0 / math.sqrt(patch_len)
    weight = jax.random.uniform(kw, (d_model, patch_len), jnp.float32, -bound, bound)

    out, nv = patch_embedding_forward(
        x, weight, d_model=d_model, patch_len=patch_len, stride=stride,
        padding=padding)
    out = jax.block_until_ready(out)

    P = (L + padding - patch_len) // stride + 1
    assert int(nv) == n_vars
    assert out.shape == (B * n_vars, P, d_model), out.shape
    assert out.dtype == jnp.float32

    # Reference with the same bf16 input quantization (f32 accumulation): tight.
    ref_q, nv_ref = reference_forward(
        x, weight, d_model=d_model, patch_len=patch_len, stride=stride,
        padding=padding, compute_dtype=jnp.bfloat16)
    assert int(nv_ref) == n_vars
    err_q = float(jnp.max(jnp.abs(out - ref_q)))
    assert jnp.allclose(out, ref_q, atol=1e-4, rtol=1e-4), err_q

    # Pure-f32 reference (the exact PyTorch math): loose tolerance covers only
    # the bf16 quantization of inputs/weight.
    ref_f, _ = reference_forward(
        x, weight, d_model=d_model, patch_len=patch_len, stride=stride,
        padding=padding, compute_dtype=jnp.float32)
    err_f = float(jnp.max(jnp.abs(out - ref_f)))
    assert jnp.allclose(out, ref_f, atol=3e-2, rtol=3e-2), err_f

    print("KERNEL_OK")
</pallas_src>

<mosaic_0001>
module attributes {stable_mosaic.version = 11 : i64} {
  func.func @patch_embed_kernel(%arg0: i32, %arg1: memref<32x16xbf16, #tpu.memory_space<vmem>>, %arg2: memref<16x128xbf16, #tpu.memory_space<vmem>>, %arg3: memref<8x128xf32, #tpu.memory_space<vmem>>, %arg4: memref<4x8x128xf32, #tpu.memory_space<vmem>>) attributes {dimension_semantics = [#tpu.dimension_semantics<parallel>], iteration_bounds = array<i64: 2>, scalar_prefetch = 0 : i64, scratch_operands = 0 : i64, tpu.core_type = #tpu.core_type<tc>, window_params = [{transform_indices = @transform_0, window_bounds = array<i64: 32, 16>}, {pipeline_mode = #tpu.pipeline_mode<synchronous>, transform_indices = @transform_1, window_bounds = array<i64: 16, 128>}, {pipeline_mode = #tpu.pipeline_mode<synchronous>, transform_indices = @transform_2, window_bounds = array<i64: 8, 128>}, {transform_indices = @transform_3, window_bounds = array<i64: 4, 8, 128>}]} {
    %c0 = arith.constant 0 : index
    %c0_0 = arith.constant 0 : index
    %0 = vector.load %arg1[%c0, %c0_0] : memref<32x16xbf16, #tpu.memory_space<vmem>>, vector<32x16xbf16>
    %c0_1 = arith.constant 0 : index
    %c0_2 = arith.constant 0 : index
    %1 = vector.load %arg2[%c0_1, %c0_2] : memref<16x128xbf16, #tpu.memory_space<vmem>>, vector<16x128xbf16>
    %cst = arith.constant dense<0.000000e+00> : vector<32x128xf32>
    %2 = tpu.matmul %0, %1, %cst {dimension_numbers = #tpu.dot_dimension_numbers<[1], [0], [0], [1], [0, 0, 1, 1], [], []>} : vector<32x16xbf16>, vector<16x128xbf16>, vector<32x128xf32> -> vector<32x128xf32>
    %3 = vector.shape_cast %2 : vector<32x128xf32> to vector<4x8x128xf32>
    %c0_3 = arith.constant 0 : index
    %c0_4 = arith.constant 0 : index
    %4 = vector.load %arg3[%c0_3, %c0_4] : memref<8x128xf32, #tpu.memory_space<vmem>>, vector<8x128xf32>
    %5 = vector.shape_cast %4 : vector<8x128xf32> to vector<1x8x128xf32>
    %6 = vector.broadcast %5 : vector<1x8x128xf32> to vector<4x8x128xf32>
    %7 = arith.addf %3, %6 : vector<4x8x128xf32>
    %c0_5 = arith.constant 0 : index
    %c0_6 = arith.constant 0 : index
    %c0_7 = arith.constant 0 : index
    %8 = vector.load %arg4[%c0_5, %c0_6, %c0_7] : memref<4x8x128xf32, #tpu.memory_space<vmem>>, vector<4x8x128xf32>
    tpu.vector_store %arg4[%c0_5, %c0_6, %c0_7], %7 {strides = array<i32>} : memref<4x8x128xf32, #tpu.memory_space<vmem>>, vector<4x8x128xf32>,
    return
  }
  func.func @transform_0(%arg0: i32) -> (i32, i32) {
    %c0_i32 = arith.constant 0 : i32
    %c0_i32_0 = arith.constant 0 : i32
    return %arg0, %c0_i32 : i32, i32
  }
  func.func @transform_1(%arg0: i32) -> (i32, i32) {
    %c0_i32 = arith.constant 0 : i32
    %c0_i32_0 = arith.constant 0 : i32
    %c0_i32_1 = arith.constant 0 : i32
    return %c0_i32, %c0_i32_0 : i32, i32
  }
  func.func @transform_2(%arg0: i32) -> (i32, i32) {
    %c0_i32 = arith.constant 0 : i32
    %c0_i32_0 = arith.constant 0 : i32
    %c0_i32_1 = arith.constant 0 : i32
    return %c0_i32, %c0_i32_0 : i32, i32
  }
  func.func @transform_3(%arg0: i32) -> (i32, i32, i32) {
    %c0_i32 = arith.constant 0 : i32
    %c0_i32_0 = arith.constant 0 : i32
    %c0_i32_1 = arith.constant 0 : i32
    return %arg0, %c0_i32, %c0_i32_0 : i32, i32, i32
  }
}

</mosaic_0001>

<bundles_post_ra>
// kernel: _patch_embedding_impl.1
= control target key start
LH: loop header
LB: loop body
LE: loop exit
PB: predicated region body
PF: predicated region fallthrough
CT: control target
= control target key end

     0   :  { %8 = vsyncpa [#allocation3], 0  ;;  %s599_s0 = inlined_call_operand.vmem [shape: bf16[64,16], index: 0, kind: input, shape index: {}]   ;;  %s600_s1 = inlined_call_operand.vmem [shape: bf16[16,128], index: 1, kind: input, shape index: {}]   ;;  %s601_s2 = inlined_call_operand.vmem [shape: f32[8,128], index: 2, kind: input, shape index: {}]   ;;  %s602_s3 = inlined_call_operand.hbm [shape: f32[8,8,128], index: 3, kind: output, shape index: {}]  }
   0x1   :  { %10 = vsyncpa [#allocation3 + $0x1], 0  ;;  %s492_s12 = smov 0   ;;  %s494_s13 = smov 0  }
   0x2   :  { %s496_s14 = smov 0   ;;  %s498_s15 = smov 0  }
   0x3 LB: > { %s513_s16 = sadd.s32 4294967295, %s467_s15   ;;  %s336_s17 = sadd.s32 4294967294, %s467_s15   ;;  %s467_s15 = sphi %s498_s15, %s608_s15   ;;  %s463_s14 = sphi %s496_s14, %s607_s14   ;;  %s459_s13 = sphi %s494_s13, %s606_s13   ;;  %s455_s12 = sphi %s492_s12, %s605_s12  }
   0x4   : > { %s517_s18 = sadd.s32 1, %s467_s15   ;;  %s91_s19 = sadd.s32 1, %s463_s14 }
   0x5   : > { %s88_s20 = ssub.s32 %s467_s15, %s517_s18  ;;  %p101_p0 = scmp.ne.s32.totalorder %s463_s14, %s459_s13 }
   0x6   : > { %p89_p1 = scmp.eq.s32.totalorder %s88_s20, 0  ;;  %p102_p2 = scmp.eq.s32.totalorder %s513_s16, 1 }
   0x7   : > { %p107_p3 = scmp.ne.s32.totalorder %s459_s13, %s455_s12  ;;  %p108_p4 = scmp.eq.s32.totalorder %s336_s17, 1 }
   0x8   : > { %s528_s21 = scalar_select %p89_p1, %s463_s14, %s91_s19  }
   0x9   : > { %p530_p5 = por %p102_p2, %p101_p0  ;;  %p534_p6 = por %p108_p4, %p107_p3 }
   0xa   : > { %p339_p7 = scmp.ge.s32.totalorder %s467_s15, 1  ;;  %p141_p8 = scmp.lt.s32.totalorder %s467_s15, 3 }
   0xc   : > { %p142_p9 = pnand %p339_p7, %p141_p8 }
   0xd   : > { %s341_s26 = sshll.u32 (!%p142_p9), %s513_s16, 2  ;;  %s162_s4 = sand.u32 (!%p142_p9), 1, %s459_s13  }
   0xe   : > { %145 = sbr.rel (%p142_p9) target bundleno = 239 (0xef), region = 32  ;;  %p166_p10 = scmp.lt.s32.totalorder (!%p142_p9), %s341_s26, 7 }
   0xf   : > { %s340_s5 = sshll.u32 (!%p142_p9), %s162_s4, 5  ;;  %s353_s10 = sshll.u32 (!%p142_p9), %s513_s16, 9 }
  0x10   : > { %s164_s8 = scalar_lea.vmem (!%p142_p9), [#allocation2], %s340_s5  ;;  %s557_s19 = scalar_lea.hbm (!%p142_p9), %s602_s3, %s353_s10 }
  0x11   : > { %s274_s9 = sshll.u32 (!%p142_p9), %s164_s8, 4  ;;  %s559_s20 = scalar_lea.sflag (!%p142_p9), [#allocation3], %s162_s4  ;;  %s552_s9 = int_to_ptr.vmem [resolvable:$true] %s274_s9 }
  0x12   : > { %s407_s16 = scalar_lea.vmem (!%p142_p9), %s552_s9, 512  ;;  %s469_s24 = smov (!%p142_p9), [#allocation2]  }
  0x13   : > { %v404_v0 = vld [vmem:[%s600_s1] sm:$0xff]   ;;  %s610_s26 = smov (!%p166_p10, %s341_s26), 7  ;;  %vm195_vm0 = vcmask 130048   ;;  %p408_p11 = scmp.ne.s32.totalorder %s552_s9, %s407_s16 }
  0x14   : > { %357 = vmatprep.subr.bf16.mxu0 %v404_v0  ;;  %s342_s27 = sshll.u32 %s610_s26, 2  ;;  %v251_v3 = vld [vmem:[%s601_s2] sm:$0xff]  ;;  %s411_s25 = sshll.u32 %s469_s24, 4  ;;  %s412_s25 = int_to_ptr.vmem [resolvable:$false] %s411_s25 }
  0x15   : > { %358 = vmatpush3.bf16.msra.mxu0 %v404_v0  ;;  %s169_s30 = scalar_lea.vmem %s599_s0, %s342_s27  ;;  %p409_p12 = pnand %p408_p11, %p530_p5 }
  0x16   : > { %v405_v1 = vld [vmem:[%s169_s30] sm:$0xff]   ;;  %v406_v2 = vld [vmem:[%s169_s30 + $0x8] sm:$0xff]   ;;  %s413_s26 = scalar_lea.vmem %s412_s25, 1024  ;;  %p414_p0 = scmp.lt.s32.totalorder %s552_s9, %s412_s25 }
  0x17   : > { %359 = vmatprep.mubr.msk.bf16.mxu0 %vm195_vm0, %v405_v1  ;;  %p410_p13 = pneg %p409_p12  ;;  %p415_p1 = scmp.lt.s32.totalorder %s413_s26, %s407_s16 }
  0x18   : > { %360 = vmatmul.mubr.msk.bf16.vlgmr.msra.gmra.mxu0 %vm195_vm0, %v406_v2 }
  0x19   : > { %p416_p2 = por %p415_p1, %p414_p0 }
  0x1b   : > { %p417_p3 = pnand %p416_p2, %p410_p13 }
  0xd8   : > { %v361_v4 = vpop.f32.mrf.mxu0 }
  0xd9   : > { %v254_v5 = vadd.f32 %v361_v4, %v251_v3 }
  0xda   : > { %v236_v6 = vpop.f32.mrf.mxu0 }
  0xdb   : > { %258 = vst [vmem:[%s164_s8 + $0x10] sm:$0xff] %v254_v5  ;;  %v252_v7 = vadd.f32 %v251_v3, %v236_v6 }
  0xdc   : > { %v362_v8 = vpop.f32.mrf.mxu0 }
  0xdd   : > { %256 = vst [vmem:[%s164_s8] sm:$0xff] %v252_v7  ;;  %v255_v9 = vadd.f32 %v362_v8, %v251_v3 }
  0xde   : > { %v239_v10 = vpop.f32.mrf.mxu0 }
  0xdf   : > { %259 = vst [vmem:[%s164_s8 + $0x18] sm:$0xff] %v255_v9  ;;  %v253_v11 = vadd.f32 %v251_v3, %v239_v10 }
  0xe1   : > { %257 = vst [vmem:[%s164_s8 + $0x8] sm:$0xff] %v253_v11 }
  0xe2   : > { %420 = shalt.err (!%p417_p3)
}
  0xe3   : > { %s421_s27 = scalar_lea.hbm %s557_s19, 512  ;;  %s425_s30 = scalar_lea.hbm %s602_s3, 1024 }
  0xe4   : > { %p422_p4 = scmp.ne.s32.totalorder %s557_s19, %s421_s27  ;;  %p426_p9 = scmp.lt.s32.totalorder %s557_s19, %s602_s3 }
  0xe5   : > { %p427_p10 = scmp.lt.s32.totalorder %s425_s30, %s421_s27 }
  0xe6   : > { %p423_p7 = pnand %p422_p4, %p530_p5 }
  0xe7   : > { %p428_p11 = por %p427_p10, %p426_p9 }
  0xe8   : > { %p424_p8 = pneg %p423_p7 }
  0xea   : > { %p429_p12 = pnand %p428_p11, %p424_p8 }
  0xec   : > { %432 = shalt.err (!%p429_p12)
}
  0xed   : > { %s470_s6 = smov 128   ;;  %s471_s7 = smov 8  }
  0xee   : > { %363 = dma.vmem_to_hbm [thread:$0]  (%p530_p5), %s552_s9, 512, %s557_s19, %s559_s20, %s470_s6, %s470_s6, %s471_s7  }
  0xef PF: > { %p369_p13 = scmp.ge.s32.totalorder %s467_s15, 2  ;;  %s289_s8 = sand.u32 1, %s455_s12  }
  0xf0   : > { %s290_s10 = scalar_lea.sflag [#allocation3], %s289_s8 }
  0xf1   : > { %p366_p0 = pnand %p369_p13, %p534_p6 }
  0xf3   : > { %p367_p1 = pneg %p366_p0 }
  0xf5   : > { %450 = dma.done.wait (%p367_p1), %s290_s10, 512  }
  0xf6   : > { %452 = vsyncadd (%p367_p1), %s290_s10, 4294966784  ;;  %p13_p2 = scmp.ge.s32.totalorder %s517_s18, 4   ;;  %s605_s12 = smov %s459_s13 }
  0xf7   : > { %s606_s13 = smov %s463_s14  ;;  %s607_s14 = smov %s528_s21 }
  0xf8   : > { %s608_s15 = smov %s517_s18  ;;  %15 = sbr.rel (!%p13_p2) target bundleno = 3 (0x3), region = 67 }
  0xfd   :  { %295 = vsyncpa [#allocation3], 1 }
  0xfe   :  { %297 = vsyncpa [#allocation3 + $0x1], 1 }

</bundles_post_ra>
